<compile_context>
chip_gen: v7x
topology: tpu7x:2x2x1
jax: 0.10.0
libtpu: 0.0.40
codegen_flags: <defaults>
</compile_context>

<pallas_src>
import jax
import jax.numpy as jnp
from jax import lax
from jax.experimental import pallas as pl
from jax.experimental.pallas import tpu as pltpu

EPS = 1e-12  # torch F.normalize default


def _l2norm_kernel(x_ref, o_ref):
    # x_ref / o_ref: (block_rows, D) tile in VMEM.
    x = x_ref[...]
    xf = x.astype(jnp.float32)
    ss = jnp.sum(xf * xf, axis=-1, keepdims=True)          # (rows, 1) sum of squares
    # 1 / max(||x||, eps)  ==  rsqrt(max(ss, eps^2))   (sqrt is monotone);
    # rsqrt runs on the EUP slot, the scale is a single vmul.
    inv = lax.rsqrt(jnp.maximum(ss, jnp.float32(EPS * EPS)))
    # Scale in f32, cast once at the store (accuracy is free: HBM-bound).
    o_ref[...] = (xf * inv).astype(o_ref.dtype)


def _cdiv(a: int, b: int) -> int:
    return -(-a // b)


def _round_up(v: int, m: int) -> int:
    return _cdiv(v, m) * m


def _tpu_generation_info():
    """Best-effort (vmem_capacity_bytes, tensorcores_per_device)."""
    vmem_cap = 128 * 1024 * 1024      # conservative default: v5e/v6e class
    num_tc = 1
    try:
        info = pltpu.get_tpu_info()
        vmem_cap = int(getattr(info, "vmem_capacity_bytes", vmem_cap))
    except Exception:
        pass
    try:
        kind = jax.devices()[0].device_kind.lower()
        if "v7" in kind or "7x" in kind:
            num_tc = 2
    except Exception:
        pass
    # v7x class: 64 MiB VMEM per TensorCore, 2 TCs per chip.
    if vmem_cap <= 64 * 1024 * 1024:
        num_tc = max(num_tc, 2)
    return vmem_cap, num_tc


def _choose_block_rows(B: int, D: int, itemsize: int, pack: int,
                       tile_target_bytes: int, vmem_budget_bytes: int,
                       num_tc: int) -> int:
    """Pick block_rows for a (block_rows, D) streaming tile."""
    # Rows giving roughly tile_target_bytes of *input* per block.
    rows = (tile_target_bytes // max(1, D * itemsize)) // pack * pack
    rows = max(pack, rows)

    # VMEM cap: 2 double-buffered input tiles + 2 output tiles (native dtype)
    # plus ~2 full f32 temporaries of the tile live inside the kernel body.
    per_row_bytes = D * (4 * itemsize + 2 * 4)
    cap_rows = (vmem_budget_bytes // per_row_bytes) // pack * pack
    if cap_rows >= pack:
        rows = min(rows, cap_rows)
    else:
        # TODO(synk): add a D-tiled two-pass path for extremely wide rows
        # (f32 D in the ~1M range); for now fall back to the minimum row block.
        rows = pack

    # Never exceed the (sublane-rounded) batch.
    rows = min(rows, _round_up(B, pack))

    # Only on 2-TensorCore chips: keep an even number of grid steps so both
    # cores get equal work.  On 1-TC chips fewer, bigger steps win.
    if num_tc >= 2 and B > pack:
        steps = _cdiv(B, rows)
        steps = max(2, steps + (steps % 2))
        rows = min(rows, _round_up(_cdiv(B, steps), pack))

    return max(pack, rows)


def l2_normalize(x: jnp.ndarray, *, block_rows: int | None = None) -> jnp.ndarray:
    """L2-normalize each row of a (B, D) array, matching torch F.normalize."""
    if x.ndim != 2:
        raise ValueError("l2_normalize expects a (batch, features) 2-D array")
    B, D = x.shape
    itemsize = jnp.dtype(x.dtype).itemsize
    pack = max(8, (4 // max(1, itemsize)) * 8)     # 8 f32 / 16 bf16 / 32 int8

    vmem_cap, num_tc = _tpu_generation_info()
    if vmem_cap <= 64 * 1024 * 1024:
        # v7x class: 64 MiB physical VMEM per TC, 3.2 TB/s HBM -> bigger tiles.
        vmem_limit = max(16 << 20, min(48 << 20, (vmem_cap * 3) // 4))
        tile_target = 6 << 20
    else:
        # v5e / v6e class: 128 MiB physical VMEM.
        vmem_limit = max(16 << 20, min(64 << 20, (vmem_cap * 3) // 4))
        tile_target = 4 << 20

    if block_rows is None:
        block_rows = _choose_block_rows(
            B, D, itemsize, pack, tile_target,
            vmem_budget_bytes=max(4 << 20, vmem_limit - (8 << 20)),
            num_tc=num_tc)

    grid = (_cdiv(B, block_rows),)

    # No padding / slicing: partial last row-block is masked by Pallas, and the
    # last block dim equals the full feature dim so any D works directly.
    return pl.pallas_call(
        _l2norm_kernel,
        out_shape=jax.ShapeDtypeStruct((B, D), x.dtype),
        grid_spec=pltpu.PrefetchScalarGridSpec(
            num_scalar_prefetch=0,
            grid=grid,
            in_specs=[pl.BlockSpec((block_rows, D), lambda i: (i, 0))],
            out_specs=pl.BlockSpec((block_rows, D), lambda i: (i, 0)),
        ),
        compiler_params=pltpu.CompilerParams(
            dimension_semantics=("parallel",),
            vmem_limit_bytes=vmem_limit,
        ),
    )(x)


def _reference(x):
    xf = x.astype(jnp.float32)
    norm = jnp.sqrt(jnp.sum(xf * xf, axis=1, keepdims=True))
    return (xf / jnp.maximum(norm, EPS)).astype(x.dtype)


if __name__ == "__main__":
    key = jax.random.PRNGKey(0)

    # Case 1: arcface-style embeddings, aligned shapes (batch=16, dim=128), f32.
    x1 = jax.random.normal(key, (16, 128), dtype=jnp.float32)
    out1 = jax.block_until_ready(l2_normalize(x1))
    ref1 = _reference(x1)
    assert out1.shape == x1.shape
    assert jnp.allclose(out1, ref1, atol=1e-5, rtol=1e-5), "mismatch vs reference (aligned f32)"
    assert jnp.allclose(jnp.linalg.norm(out1, axis=1), 1.0, atol=1e-4)

    # Case 2: unaligned B and D (partial last row-block + non-128 feature dim),
    # including an all-zero row to exercise the eps clamp.
    x2 = jax.random.normal(jax.random.PRNGKey(1), (13, 96), dtype=jnp.float32)
    x2 = x2.at[0].set(0.0)
    out2 = jax.block_until_ready(l2_normalize(x2))
    ref2 = _reference(x2)
    assert out2.shape == x2.shape
    assert jnp.allclose(out2, ref2, atol=1e-5, rtol=1e-5), "mismatch vs reference (unaligned f32)"
    assert jnp.allclose(out2[0], 0.0), "zero row must stay zero (eps clamp)"
    assert jnp.allclose(jnp.linalg.norm(out2[1:], axis=1), 1.0, atol=1e-4)

    # Case 3: bf16, unaligned batch (locks in the f32-scale path and masked
    # partial-block behavior for sub-32-bit dtypes).
    x3 = jax.random.normal(jax.random.PRNGKey(2), (13, 200)).astype(jnp.bfloat16)
    out3 = jax.block_until_ready(l2_normalize(x3))
    ref3 = _reference(x3)
    assert out3.shape == x3.shape
    assert jnp.allclose(out3.astype(jnp.float32), ref3.astype(jnp.float32),
                        atol=1e-2, rtol=1e-2), "mismatch vs reference (bf16)"
    assert jnp.allclose(jnp.linalg.norm(out3.astype(jnp.float32), axis=1), 1.0, atol=1e-2)

    print("KERNEL_OK")
</pallas_src>

<mosaic_0001>
module attributes {stable_mosaic.version = 11 : i64} {
  func.func @_l2norm_kernel(%arg0: i32, %arg1: memref<16x128xf32, #tpu.memory_space<vmem>>, %arg2: memref<16x128xf32, #tpu.memory_space<vmem>>) attributes {dimension_semantics = [#tpu.dimension_semantics<parallel>], iteration_bounds = array<i64: 1>, scalar_prefetch = 0 : i64, scratch_operands = 0 : i64, tpu.core_type = #tpu.core_type<tc>, window_params = [{transform_indices = @transform_0, window_bounds = array<i64: 16, 128>}, {transform_indices = @transform_1, window_bounds = array<i64: 16, 128>}]} {
    %c0 = arith.constant 0 : index
    %c0_0 = arith.constant 0 : index
    %0 = vector.load %arg1[%c0, %c0_0] : memref<16x128xf32, #tpu.memory_space<vmem>>, vector<16x128xf32>
    %1 = arith.mulf %0, %0 : vector<16x128xf32>
    %cst = arith.constant dense<0.000000e+00> : vector<16xf32>
    %2 = vector.multi_reduction <add>, %1, %cst [1] : vector<16x128xf32> to vector<16xf32>
    %3 = vector.shape_cast %2 : vector<16xf32> to vector<16x1xf32>
    %cst_1 = arith.constant 1.000000e-24 : f32
    %4 = vector.broadcast %cst_1 : f32 to vector<16x1xf32>
    %5 = arith.maximumf %3, %4 : vector<16x1xf32>
    %6 = math.rsqrt %5 : vector<16x1xf32>
    %7 = vector.broadcast %6 : vector<16x1xf32> to vector<16x128xf32>
    %8 = arith.mulf %0, %7 : vector<16x128xf32>
    %c0_2 = arith.constant 0 : index
    %c0_3 = arith.constant 0 : index
    %9 = vector.load %arg2[%c0_2, %c0_3] : memref<16x128xf32, #tpu.memory_space<vmem>>, vector<16x128xf32>
    tpu.vector_store %arg2[%c0_2, %c0_3], %8 {strides = array<i32>} : memref<16x128xf32, #tpu.memory_space<vmem>>, vector<16x128xf32>,
    return
  }
  func.func @transform_0(%arg0: i32) -> (i32, i32) {
    %c0_i32 = arith.constant 0 : i32
    %c0_i32_0 = arith.constant 0 : i32
    return %arg0, %c0_i32 : i32, i32
  }
  func.func @transform_1(%arg0: i32) -> (i32, i32) {
    %c0_i32 = arith.constant 0 : i32
    %c0_i32_0 = arith.constant 0 : i32
    return %arg0, %c0_i32 : i32, i32
  }
}

</mosaic_0001>

<bundles_post_ra>
// kernel: tpu_custom_call.1
= control target key start
LH: loop header
LB: loop body
LE: loop exit
PB: predicated region body
PF: predicated region fallthrough
CT: control target
= control target key end

     0   :  { %6 = vsyncpa [#allocation3], 0  ;;  %s156_s0 = inlined_call_operand.hbm [shape: f32[16,128], index: 0, kind: input, shape index: {}]   ;;  %s157_s1 = inlined_call_operand.hbm [shape: f32[16,128], index: 1, kind: output, shape index: {}]  }
   0x1   :  { %7 = vsyncpa [#allocation4], 0  ;;  %s112_s6 = smov [#allocation2]   ;;  %s64_s10 = scalar_lea.hbm %s156_s0, 256 }
   0x2   :  { %s13_s7 = sshll.u32 %s112_s6, 4  ;;  %p65_p0 = scmp.ne.s32.totalorder %s156_s0, %s64_s10  ;;  %s14_s7 = int_to_ptr.vmem [resolvable:$true] %s13_s7 }
   0x3   :  { %p68_p1 = scmp.lt.u32.totalorder %s64_s10, %s156_s0 }
   0x5   :  { %p70_p2 = pnand %p68_p1, %p65_p0 }
   0x7   :  { %73 = shalt.err (!%p70_p2)
}
   0x8   :  { %s74_s15 = scalar_lea.vmem %s14_s7, 256  ;;  %p79_p4 = scmp.lt.s32.totalorder %s14_s7, %s14_s7 }
   0x9   :  { %p75_p3 = scmp.ne.s32.totalorder %s14_s7, %s74_s15  ;;  %p80_p5 = scmp.lt.s32.totalorder %s74_s15, %s74_s15 }
   0xb   :  { %p81_p6 = por %p80_p5, %p79_p4 }
   0xd   :  { %p82_p7 = pnand %p81_p6, %p75_p3 }
   0xf   :  { %85 = shalt.err (!%p82_p7)
}
  0x10   :  { %s113_s16 = smov 128   ;;  %s114_s17 = smov 8  }
  0x11   :  { %19 = dma.hbm_to_vmem [thread:$0]  %s156_s0, 256, %s14_s7, [#allocation3], %s113_s16, %s113_s16, %s114_s17  }
  0x12   :  { %108 = dma.done.wait [#allocation3], 256  }
  0x13   :  { %109 = vsyncadd [#allocation3], 4294967040  ;;  %v23_v0 = vld [vmem:[#allocation2] sm:$0xff]  ;;  %v24_v1 = vld [vmem:[#allocation2 + $0x8] sm:$0xff]  ;;  %s115_s20 = smov [#allocation5]  }
  0x14   :  { %v25_v2 = vmul.f32 %v23_v0, %v23_v0  ;;  %v26_v3 = vmul.f32 %v24_v1, %v24_v1  ;;  %s44_s21 = sshll.u32 %s115_s20, 4  ;;  %s45_s21 = int_to_ptr.vmem [resolvable:$true] %s44_s21 }
  0x15   :  { %s86_s0 = scalar_lea.vmem %s45_s21, 256  ;;  %p91_p9 = scmp.lt.s32.totalorder %s45_s21, %s45_s21 }
  0x16   :  { %27 = vadd.xlane.f32.xlu0 %v25_v2  ;;  %p87_p8 = scmp.ne.s32.totalorder %s45_s21, %s86_s0  ;;  %p92_p10 = scmp.lt.s32.totalorder %s86_s0, %s86_s0 }
  0x18   :  { %p93_p11 = por %p92_p10, %p91_p9 }
  0x1a   :  { %29 = vadd.xlane.f32.xlu0 %v26_v3  ;;  %p94_p12 = pnand %p93_p11, %p87_p8 }
  0xa3   :  { %v28_v4 = vpop.xlane.xlu0 %27 }
  0xa4   :  { %v31_v5 = vmax.f32 %v28_v4, 1e-24 }
  0xa6   :  { %60 = vrsqrt.f32 %v31_v5 }
  0xa7   :  { %v30_v6 = vpop.xlane.xlu0 %29 }
  0xa8   :  { %v32_v7 = vmax.f32 %v30_v6, 1e-24 }
  0xaa   :  { %62 = vrsqrt.f32 %v32_v7 }
  0xb0   :  { %v61_v8 = vpop.eup %60 }
  0xb1   :  { %v35_v9 = vmul.f32 %v61_v8, %v23_v0 }
  0xb3   :  { %37 = vst [vmem:[#allocation5] sm:$0xff] %v35_v9 }
  0xb4   :  { %v63_v10 = vpop.eup %62 }
  0xb5   :  { %v36_v11 = vmul.f32 %v63_v10, %v24_v1 }
  0xb7   :  { %38 = vst [vmem:[#allocation5 + $0x8] sm:$0xff] %v36_v11 }
  0xb8   :  { %97 = shalt.err (!%p94_p12)
}
  0xb9   :  { %s98_s24 = scalar_lea.hbm %s157_s1, 256 }
  0xba   :  { %p99_p13 = scmp.ne.s32.totalorder %s157_s1, %s98_s24  ;;  %p102_p0 = scmp.lt.u32.totalorder %s98_s24, %s157_s1 }
  0xbc   :  { %p104_p1 = pnand %p102_p0, %p99_p13 }
  0xbe   :  { %107 = shalt.err (!%p104_p1)
}
  0xbf   :  { %50 = dma.vmem_to_hbm [thread:$0]  %s45_s21, 256, %s157_s1, [#allocation4], %s113_s16, %s113_s16, %s114_s17  }
  0xc0   :  { %110 = dma.done.wait [#allocation4], 256  }
  0xc1   :  { %111 = vsyncadd [#allocation4], 4294967040 }
  0xc2   :  { %54 = vsyncpa [#allocation3], 1 }
  0xc3   :  { %55 = vsyncpa [#allocation4], 1 }

</bundles_post_ra>
